<compile_context>
chip_gen: v5e
topology: v5e:2x2
jax: 0.10.0
libtpu: 0.0.40
codegen_flags: <defaults>
</compile_context>

<pallas_src>
import functools

import jax
import jax.numpy as jnp
from jax.experimental import pallas as pl
from jax.experimental.pallas import tpu as pltpu


LN_EPS = 1e-5  # torch.nn.LayerNorm default


def _round_up(x, m):
    return (x + m - 1) // m * m


def _vmem_limit_bytes():
    """Per-generation VMEM ceiling with headroom (v5e/v6e: 128 MiB, v7x: 64 MiB)."""
    cap = 64 * 1024 * 1024  # conservative fallback (v7x per-TC)
    try:
        cap = int(pltpu.get_tpu_info().vmem_capacity_bytes)
    except Exception:
        pass
    return min(cap * 3 // 4, 112 * 1024 * 1024)


def _num_tensorcores():
    """2 on v7x megacore, 1 on v5e/v6e (best-effort, safe fallback to 1)."""
    try:
        kind = (getattr(jax.devices()[0], "device_kind", "") or "").lower()
        if "v7" in kind:
            return 2
    except Exception:
        pass
    return 1


# ----------------------------------------------------------------------------
# Kernels
# ----------------------------------------------------------------------------

def _layernorm_epilogue(y, p_ref, half, half_pad):
    """bias + LayerNorm(+affine) on an f32 (tm, half_pad) tile."""
    y = y + p_ref[0:1, :]                       # bias (zero in padded columns)
    if half == half_pad:
        mean = jnp.mean(y, axis=-1, keepdims=True)
        c = y - mean
        var = jnp.mean(c * c, axis=-1, keepdims=True)
        yn = c * jax.lax.rsqrt(var + LN_EPS)
    else:
        # Padded columns of y are exactly zero (zero-padded W and bias), so the
        # statistics reduce to plain sums over the full lane-dense width.
        inv_n = 1.0 / half
        s1 = jnp.sum(y, axis=-1, keepdims=True)
        s2 = jnp.sum(y * y, axis=-1, keepdims=True)
        mean = s1 * inv_n
        var = jnp.maximum(s2 * inv_n - mean * mean, 0.0)
        yn = (y - mean) * jax.lax.rsqrt(var + LN_EPS)
    # gamma / beta are zero-padded -> padded output columns are exactly zero.
    return yn * p_ref[1:2, :] + p_ref[2:3, :]


def _merge_kernel_resident(x_ref, w_ref, p_ref, o_ref, *, half, half_pad):
    """Single-pass row block: (tm, total) @ (total, half_pad), fused LN epilogue."""
    y = jnp.dot(x_ref[...], w_ref[...], preferred_element_type=jnp.float32)
    out = _layernorm_epilogue(y, p_ref, half, half_pad)
    # TODO(synk): dropout is identity in eval mode (training=False,
    # enable_sampling=False); stochastic path (pltpu.prng_*) not emitted.
    o_ref[...] = out.astype(o_ref.dtype)


def _merge_kernel_streaming(x_ref, w_ref, p_ref, o_ref, acc_ref, *, half, half_pad):
    """K-streamed fallback for very large `total` (weight does not fit VMEM)."""
    k = pl.program_id(1)

    @pl.when(k == 0)
    def _():
        acc_ref[...] = jnp.zeros_like(acc_ref)

    acc_ref[...] += jnp.dot(x_ref[...], w_ref[...],
                            preferred_element_type=jnp.float32)

    @pl.when(k == pl.num_programs(1) - 1)
    def _():
        out = _layernorm_epilogue(acc_ref[...], p_ref, half, half_pad)
        o_ref[...] = out.astype(o_ref.dtype)


# ----------------------------------------------------------------------------
# Tiling / dispatch
# ----------------------------------------------------------------------------

def _pick_tiles_streaming(half_pad, itemsize, budget):
    """(tm, tk) for the K-streaming fallback; prefer tm >= 128, shrink tk first."""
    base = 2 * 3 * half_pad * 4                                   # packed params
    for tk in (2048, 1024, 512, 256, 128):
        fixed = base + 2 * tk * half_pad * 2                      # W blocks (bf16)
        per_row = (2 * tk * 2                                     # x block (bf16)
                   + 2 * half_pad * itemsize                      # out block
                   + half_pad * 4                                 # f32 accumulator
                   + 4 * half_pad * 4)                            # epilogue temps
        for tm in (1024, 512, 256, 128):
            if fixed + tm * per_row <= budget:
                return tm, tk
    return 128, 128


def _merge_proj_norm_2d(x2d, w_p, params_p, *, half, out_dtype):
    """(N, total) @ (total, half_pad) + bias, LayerNorm over `half` real features."""
    n, total = x2d.shape
    half_pad = w_p.shape[1]
    itemsize = jnp.dtype(out_dtype).itemsize

    vmem_limit = _vmem_limit_bytes()
    budget = int(vmem_limit * 0.85)
    num_tc = _num_tensorcores()

    # Resident-weight path: weight DMA'd once, no K axis, no accumulator.
    w_bytes = total * half_pad * 2                                 # bf16
    resident_fixed = 2 * w_bytes + 2 * 3 * half_pad * 4
    resident_per_row = (2 * total * 2                              # x block (bf16)
                        + 2 * half_pad * itemsize                  # out block
                        + 4 * half_pad * 4)                        # epilogue temps
    use_resident = resident_fixed + 128 * resident_per_row <= budget

    if use_resident:
        tm = 128
        for cand in (1024, 512, 256, 128):
            if resident_fixed + cand * resident_per_row <= budget:
                tm = cand
                break
        tk = total
    else:
        tm, tk = _pick_tiles_streaming(half_pad, itemsize, budget)

    # Don't tile far past N (wasted padded rows), keep tm a sublane multiple.
    tm = min(tm, max(128, _round_up(n, 8)))
    tm = _round_up(tm, 8)
    # Only on 2-TensorCore chips (v7x): keep >= 2 row blocks, and an even block
    # count, so the 'parallel' row axis shards across both cores.
    if num_tc > 1:
        while tm > 64 and -(-n // tm) < 2:
            tm = max(64, _round_up(tm // 2, 8))

    n_pad = _round_up(n, tm)
    if num_tc > 1 and (n_pad // tm) % num_tc != 0:
        n_pad += tm * (num_tc - (n_pad // tm) % num_tc)
    if n_pad != n:
        x2d = jnp.pad(x2d, ((0, n_pad - n), (0, 0)))

    if use_resident:
        kernel = functools.partial(_merge_kernel_resident,
                                   half=half, half_pad=half_pad)
        out = pl.pallas_call(
            kernel,
            out_shape=jax.ShapeDtypeStruct((n_pad, half_pad), out_dtype),
            grid_spec=pltpu.PrefetchScalarGridSpec(
                num_scalar_prefetch=0,
                grid=(n_pad // tm,),
                in_specs=[
                    pl.BlockSpec((tm, total), lambda i: (i, 0)),        # x rows
                    pl.BlockSpec((total, half_pad), lambda i: (0, 0)),  # W resident
                    pl.BlockSpec((3, half_pad), lambda i: (0, 0)),      # bias/gamma/beta
                ],
                out_specs=pl.BlockSpec((tm, half_pad), lambda i: (i, 0)),
            ),
            compiler_params=pltpu.CompilerParams(
                dimension_semantics=("parallel",),
                vmem_limit_bytes=vmem_limit,
            ),
        )(x2d, w_p, params_p)
    else:
        # Pad the reduction dim to a tk multiple (extra K contributions are zero).
        total_pad = _round_up(total, tk)
        w_stream = w_p
        if total_pad != total:
            x2d = jnp.pad(x2d, ((0, 0), (0, total_pad - total)))
            w_stream = jnp.pad(w_p, ((0, total_pad - total), (0, 0)))
        kernel = functools.partial(_merge_kernel_streaming,
                                   half=half, half_pad=half_pad)
        out = pl.pallas_call(
            kernel,
            out_shape=jax.ShapeDtypeStruct((n_pad, half_pad), out_dtype),
            grid_spec=pltpu.PrefetchScalarGridSpec(
                num_scalar_prefetch=0,
                grid=(n_pad // tm, total_pad // tk),
                in_specs=[
                    pl.BlockSpec((tm, tk), lambda i, k: (i, k)),          # x rows
                    pl.BlockSpec((tk, half_pad), lambda i, k: (k, 0)),    # W over K
                    pl.BlockSpec((3, half_pad), lambda i, k: (0, 0)),     # params
                ],
                out_specs=pl.BlockSpec((tm, half_pad), lambda i, k: (i, 0)),
                scratch_shapes=[pltpu.VMEM((tm, half_pad), jnp.float32)],
            ),
            compiler_params=pltpu.CompilerParams(
                dimension_semantics=("parallel", "arbitrary"),
                vmem_limit_bytes=vmem_limit,
            ),
        )(x2d, w_stream, params_p)

    return out[:n, :half]


@functools.partial(jax.jit, static_argnames=("kernel_size", "half"))
def _merge2d_forward(x, w_p, params_p, *, kernel_size, half):
    B, C, H, W = x.shape
    hk, wk = kernel_size
    h, w_ = H // hk, W // wk
    out_dtype = x.dtype

    # 'b c (h hk) (w wk) -> b h w (hk wk c)'
    # Cast to bf16 BEFORE the layout transpose so the transpose writes bf16
    # (halves its HBM writeback and the kernel's activation read).
    # TODO(synk): the patch gather itself stays as an XLA transpose because the
    # module contract is NCHW in / NCHW out; folding it into the kernel's
    # index_map would need an in-VMEM (hk, wk, C) rearrangement per block.
    xb = x.astype(jnp.bfloat16)
    xr = xb.reshape(B, C, h, hk, w_, wk)
    xr = jnp.transpose(xr, (0, 2, 4, 3, 5, 1))           # (B, h, w, hk, wk, C)
    x2d = xr.reshape(B * h * w_, hk * wk * C)            # (N, total)

    out2d = _merge_proj_norm_2d(x2d, w_p, params_p, half=half, out_dtype=out_dtype)

    # 'b h w c -> b c h w'
    out = out2d.reshape(B, h, w_, half)
    return jnp.transpose(out, (0, 3, 1, 2))


class Merge2dPallas:
    """JAX/Pallas port of Merge2d (inference / eval mode)."""

    def __init__(self, in_channels, kernel_size, key,
                 drop_proj=0.05, enable_sampling=False):
        if isinstance(kernel_size, int):
            kernel_size = (kernel_size, kernel_size)
        self.in_channels = in_channels
        self.kernel_size = tuple(kernel_size)
        self.drop_proj = drop_proj
        self.enable_sampling = enable_sampling

        total = in_channels * kernel_size[0] * kernel_size[1]
        half = total // 2
        half_pad = max(128, _round_up(half, 128))
        self.total = total
        self.half = half
        self.out_channels = half
        self.half_pad = half_pad

        k_w, k_b = jax.random.split(key)
        # Deterministic synthetic init (roughly torch Linear's uniform fan-in init).
        bound = 1.0 / (total ** 0.5)
        w = jax.random.uniform(k_w, (total, half), jnp.float32, -bound, bound)
        b = jax.random.uniform(k_b, (half,), jnp.float32, -bound, bound)
        gamma = jnp.ones((half,), jnp.float32)
        beta = jnp.zeros((half,), jnp.float32)

        # Unpadded copies (reference / introspection). Weights held bf16 so the
        # MXU is fed bf16 operands directly (f32 accumulation in-kernel).
        self.w = w.astype(jnp.bfloat16)
        self.b = b
        self.gamma = gamma
        self.beta = beta

        # Lane-dense (multiple-of-128) padded parameters used by the kernel.
        cpad = half_pad - half
        self.w_p = jnp.pad(self.w, ((0, 0), (0, cpad)))
        # bias / gamma / beta packed into one (3, half_pad) f32 block.
        self.params_p = jnp.stack([
            jnp.pad(b, (0, cpad)),
            jnp.pad(gamma, (0, cpad)),
            jnp.pad(beta, (0, cpad)),
        ], axis=0)

    def __call__(self, x):
        # x: (B, C, H, W) NCHW, matching the PyTorch module.
        return _merge2d_forward(x, self.w_p, self.params_p,
                                kernel_size=self.kernel_size, half=self.half)


def _reference(x, module):
    """Pure-JAX reference mirroring the kernel's numerics (bf16 MXU, f32 LN)."""
    B, C, H, W = x.shape
    hk, wk = module.kernel_size
    h, w_ = H // hk, W // wk
    xr = x.reshape(B, C, h, hk, w_, wk)
    xr = jnp.transpose(xr, (0, 2, 4, 3, 5, 1)).reshape(B, h, w_, hk * wk * C)
    y = jnp.dot(xr.astype(jnp.bfloat16), module.w,
                preferred_element_type=jnp.float32) + module.b
    mean = jnp.mean(y, axis=-1, keepdims=True)
    var = jnp.mean((y - mean) ** 2, axis=-1, keepdims=True)
    yn = (y - mean) * jax.lax.rsqrt(var + LN_EPS)
    y = yn * module.gamma + module.beta
    return jnp.transpose(y, (0, 3, 1, 2)).astype(x.dtype)


if __name__ == "__main__":
    key = jax.random.PRNGKey(0)
    k_param, k_x = jax.random.split(key)

    in_channels = 4
    kernel_size = (2, 2)
    module = Merge2dPallas(in_channels, kernel_size, k_param)

    # Input: (B, C, H, W) = (2, 4, 16, 16) -> output (2, 8, 8, 8)
    x = jax.random.normal(k_x, (2, in_channels, 16, 16), jnp.float32)

    out = module(x)
    out = jax.block_until_ready(out)

    ref = _reference(x, module)
    assert out.shape == (2, module.half, 8, 8), out.shape
    err = float(jnp.max(jnp.abs(out - ref)))
    assert jnp.allclose(out, ref, atol=1e-3, rtol=1e-3), err

    print("KERNEL_OK")
</pallas_src>

<mosaic_0001>
module attributes {stable_mosaic.version = 11 : i64} {
  func.func @_merge_kernel_resident(%arg0: i32, %arg1: memref<128x16xbf16, #tpu.memory_space<vmem>>, %arg2: memref<16x128xbf16, #tpu.memory_space<vmem>>, %arg3: memref<3x128xf32, #tpu.memory_space<vmem>>, %arg4: memref<128x128xf32, #tpu.memory_space<vmem>>) attributes {dimension_semantics = [#tpu.dimension_semantics<parallel>], iteration_bounds = array<i64: 1>, scalar_prefetch = 0 : i64, scratch_operands = 0 : i64, tpu.core_type = #tpu.core_type<tc>, window_params = [{transform_indices = @transform_0, window_bounds = array<i64: 128, 16>}, {pipeline_mode = #tpu.pipeline_mode<synchronous>, transform_indices = @transform_1, window_bounds = array<i64: 16, 128>}, {pipeline_mode = #tpu.pipeline_mode<synchronous>, transform_indices = @transform_2, window_bounds = array<i64: 3, 128>}, {transform_indices = @transform_3, window_bounds = array<i64: 128, 128>}]} {
    %c0 = arith.constant 0 : index
    %c0_0 = arith.constant 0 : index
    %0 = vector.load %arg1[%c0, %c0_0] : memref<128x16xbf16, #tpu.memory_space<vmem>>, vector<128x16xbf16>
    %c0_1 = arith.constant 0 : index
    %c0_2 = arith.constant 0 : index
    %1 = vector.load %arg2[%c0_1, %c0_2] : memref<16x128xbf16, #tpu.memory_space<vmem>>, vector<16x128xbf16>
    %cst = arith.constant dense<0.000000e+00> : vector<128x128xf32>
    %2 = tpu.matmul %0, %1, %cst {dimension_numbers = #tpu.dot_dimension_numbers<[1], [0], [0], [1], [0, 0, 1, 1], [], []>} : vector<128x16xbf16>, vector<16x128xbf16>, vector<128x128xf32> -> vector<128x128xf32>
    %c0_3 = arith.constant 0 : index
    %c0_4 = arith.constant 0 : index
    %3 = vector.load %arg3[%c0_3, %c0_4] : memref<3x128xf32, #tpu.memory_space<vmem>>, vector<1x128xf32>
    %4 = vector.broadcast %3 : vector<1x128xf32> to vector<128x128xf32>
    %5 = arith.addf %2, %4 : vector<128x128xf32>
    %cst_5 = arith.constant dense<0.000000e+00> : vector<128xf32>
    %6 = vector.multi_reduction <add>, %5, %cst_5 [1] : vector<128x128xf32> to vector<128xf32>
    %7 = vector.shape_cast %6 : vector<128xf32> to vector<128x1xf32>
    %8 = arith.mulf %5, %5 : vector<128x128xf32>
    %cst_6 = arith.constant dense<0.000000e+00> : vector<128xf32>
    %9 = vector.multi_reduction <add>, %8, %cst_6 [1] : vector<128x128xf32> to vector<128xf32>
    %10 = vector.shape_cast %9 : vector<128xf32> to vector<128x1xf32>
    %cst_7 = arith.constant 1.250000e-01 : f32
    %11 = vector.broadcast %cst_7 : f32 to vector<128x1xf32>
    %12 = arith.mulf %7, %11 : vector<128x1xf32>
    %cst_8 = arith.constant 1.250000e-01 : f32
    %13 = vector.broadcast %cst_8 : f32 to vector<128x1xf32>
    %14 = arith.mulf %10, %13 : vector<128x1xf32>
    %15 = arith.mulf %12, %12 : vector<128x1xf32>
    %16 = arith.subf %14, %15 : vector<128x1xf32>
    %cst_9 = arith.constant 0.000000e+00 : f32
    %17 = vector.broadcast %cst_9 : f32 to vector<128x1xf32>
    %18 = arith.maximumf %16, %17 : vector<128x1xf32>
    %19 = vector.broadcast %12 : vector<128x1xf32> to vector<128x128xf32>
    %20 = arith.subf %5, %19 : vector<128x128xf32>
    %cst_10 = arith.constant 9.99999974E-6 : f32
    %21 = vector.broadcast %cst_10 : f32 to vector<128x1xf32>
    %22 = arith.addf %18, %21 : vector<128x1xf32>
    %23 = math.rsqrt %22 : vector<128x1xf32>
    %24 = vector.broadcast %23 : vector<128x1xf32> to vector<128x128xf32>
    %25 = arith.mulf %20, %24 : vector<128x128xf32>
    %c1 = arith.constant 1 : index
    %c0_11 = arith.constant 0 : index
    %26 = vector.load %arg3[%c1, %c0_11] : memref<3x128xf32, #tpu.memory_space<vmem>>, vector<1x128xf32>
    %27 = vector.broadcast %26 : vector<1x128xf32> to vector<128x128xf32>
    %28 = arith.mulf %25, %27 : vector<128x128xf32>
    %c2 = arith.constant 2 : index
    %c0_12 = arith.constant 0 : index
    %29 = vector.load %arg3[%c2, %c0_12] : memref<3x128xf32, #tpu.memory_space<vmem>>, vector<1x128xf32>
    %30 = vector.broadcast %29 : vector<1x128xf32> to vector<128x128xf32>
    %31 = arith.addf %28, %30 : vector<128x128xf32>
    %c0_13 = arith.constant 0 : index
    %c0_14 = arith.constant 0 : index
    %32 = vector.load %arg4[%c0_13, %c0_14] : memref<128x128xf32, #tpu.memory_space<vmem>>, vector<128x128xf32>
    tpu.vector_store %arg4[%c0_13, %c0_14], %31 {strides = array<i32>} : memref<128x128xf32, #tpu.memory_space<vmem>>, vector<128x128xf32>,
    return
  }
  func.func @transform_0(%arg0: i32) -> (i32, i32) {
    %c0_i32 = arith.constant 0 : i32
    %c0_i32_0 = arith.constant 0 : i32
    return %arg0, %c0_i32 : i32, i32
  }
  func.func @transform_1(%arg0: i32) -> (i32, i32) {
    %c0_i32 = arith.constant 0 : i32
    %c0_i32_0 = arith.constant 0 : i32
    %c0_i32_1 = arith.constant 0 : i32
    return %c0_i32, %c0_i32_0 : i32, i32
  }
  func.func @transform_2(%arg0: i32) -> (i32, i32) {
    %c0_i32 = arith.constant 0 : i32
    %c0_i32_0 = arith.constant 0 : i32
    %c0_i32_1 = arith.constant 0 : i32
    return %c0_i32, %c0_i32_0 : i32, i32
  }
  func.func @transform_3(%arg0: i32) -> (i32, i32) {
    %c0_i32 = arith.constant 0 : i32
    %c0_i32_0 = arith.constant 0 : i32
    return %arg0, %c0_i32 : i32, i32
  }
}

</mosaic_0001>

<bundles_post_ra>
// kernel: _merge2d_forward.1
= control target key start
LH: loop header
LB: loop body
LE: loop exit
PB: predicated region body
PF: predicated region fallthrough
CT: control target
= control target key end

     0   :  { %vm81_vm0 = vcmask 130048   ;;  %s1081_s1 = inlined_call_operand.vmem [shape: bf16[16,128], index: 1, kind: input, shape index: {}]   ;;  %s1082_s0 = inlined_call_operand.vmem [shape: bf16[128,16], index: 0, kind: input, shape index: {}]   ;;  %s1083_s2 = inlined_call_operand.vmem [shape: f32[3,128], index: 2, kind: input, shape index: {}]   ;;  %s1084_s3 = inlined_call_operand.vmem [shape: f32[128,128], index: 3, kind: output, shape index: {}]  }
   0x1   :  { %v631_v0 = vld [vmem:[%s1081_s1] sm:$0xff]  ;;  %v625_v2 = vld [vmem:[%s1082_s0 + $0x10] sm:$0xff]  ;;  %v624_v5 = vld [vmem:[%s1082_s0 + $0x8] sm:$0xff] }
   0x2   :  { %v623_v1 = vld [vmem:[%s1082_s0] sm:$0xff]  ;;  %113 = vmatpush.bf16.msra.mxu0 %v631_v0  ;;  %632 = vmatpush.bf16.msra.mxu1 %v631_v0  ;;  %v629_v3 = vld [vmem:[%s1082_s0 + $0x30] sm:$0xff]  ;;  %v626_v6 = vld [vmem:[%s1082_s0 + $0x18] sm:$0xff] }
   0x3   :  { %v627_v4 = vld [vmem:[%s1082_s0 + $0x20] sm:$0xff]  ;;  %634 = vmatpush.bf16.msra.mxu3 %v631_v0  ;;  %633 = vmatpush.bf16.msra.mxu2 %v631_v0  ;;  %v630_v7 = vld [vmem:[%s1082_s0 + $0x38] sm:$0xff]  ;;  %v628_v8 = vld [vmem:[%s1082_s0 + $0x28] sm:$0xff] }
   0x4   :  { %v728_v9 = vld [vmem:[%s1083_s2] ss:$0 sm:$0xff] }
   0x5   :  { %615 = vmatmul.msk.bf16.vlgmr.msra.gmra.mxu0 %vm81_vm0, %v623_v1  ;;  %617 = vmatmul.msk.bf16.vlgmr.msra.gmra.mxu1 %vm81_vm0, %v625_v2 }
   0x6   :  { %621 = vmatmul.msk.bf16.vlgmr.msra.gmra.mxu3 %vm81_vm0, %v629_v3  ;;  %619 = vmatmul.msk.bf16.vlgmr.msra.gmra.mxu2 %vm81_vm0, %v627_v4 }
  0x15   :  { %616 = vmatmul.msk.bf16.gmra.mxu0 %vm81_vm0, %v624_v5  ;;  %618 = vmatmul.msk.bf16.gmra.mxu1 %vm81_vm0, %v626_v6 }
  0x16   :  { %622 = vmatmul.msk.bf16.gmra.mxu3 %vm81_vm0, %v630_v7  ;;  %620 = vmatmul.msk.bf16.gmra.mxu2 %vm81_vm0, %v628_v8 }
  0x82   :  { %v115_v10 = vpop.f32.mrf.mxu0  ;;  %v125_v11 = vpop.f32.mrf.mxu1 }
  0x83   :  { %v731_v12 = vadd.f32 %v728_v9, %v115_v10  ;;  %v734_v13 = vadd.f32 %v728_v9, %v125_v11 }
  0x85   :  { %163 = vadd.xlane.f32.xlu2 %v734_v13  ;;  %155 = vadd.xlane.f32.xlu0 %v731_v12  ;;  %v187_v14 = vmul.f32 %v731_v12, %v731_v12  ;;  %v191_v16 = vmul.f32 %v734_v13, %v734_v13 }
  0x87   :  { %203 = vadd.xlane.f32.xlu1 %v187_v14 }
  0x89   :  { %v145_v15 = vpop.f32.mrf.mxu3  ;;  %v135_v19 = vpop.f32.mrf.mxu2 }
  0x8a   :  { %v743_v17 = vadd.f32 %v728_v9, %v145_v15  ;;  %v117_v20 = vpop.f32.mrf.mxu0  ;;  %v749_v21 = vadd.f32 %v728_v9, %v135_v19  ;;  %v127_v25 = vpop.f32.mrf.mxu1 }
  0x8b   :  { %v752_v23 = vadd.f32 %v728_v9, %v117_v20  ;;  %v763_v28 = vadd.f32 %v728_v9, %v127_v25 }
  0x8c   :  { %v199_v18 = vmul.f32 %v743_v17, %v743_v17  ;;  %v195_v26 = vmul.f32 %v749_v21, %v749_v21 }
  0x8d   :  { %211 = vadd.xlane.f32.xlu2 %v191_v16  ;;  %179 = vadd.xlane.f32.xlu0 %v743_v17  ;;  %v188_v32 = vmul.f32 %v752_v23, %v752_v23  ;;  %v192_v33 = vmul.f32 %v763_v28, %v763_v28 }
  0x8f   :  { %227 = vadd.xlane.f32.xlu1 %v199_v18 }
  0x91   :  { %v147_v22 = vpop.f32.mrf.mxu3  ;;  %v137_v30 = vpop.f32.mrf.mxu2 }
  0x92   :  { %v755_v24 = vadd.f32 %v728_v9, %v147_v22  ;;  %v120_v27 = vpop.f32.mrf.mxu0  ;;  %v771_v31 = vadd.f32 %v728_v9, %v137_v30  ;;  %v130_v35 = vpop.f32.mrf.mxu1 }
  0x93   :  { %v766_v29 = vadd.f32 %v728_v9, %v120_v27  ;;  %v780_v37 = vadd.f32 %v728_v9, %v130_v35 }
  0x94   :  { %v196_v34 = vmul.f32 %v771_v31, %v771_v31  ;;  %v200_v53 = vmul.f32 %v755_v24, %v755_v24 }
  0x95   :  { %171 = vadd.xlane.f32.xlu2 %v749_v21  ;;  %157 = vadd.xlane.f32.xlu0 %v752_v23  ;;  %v193_v39 = vmul.f32 %v780_v37, %v780_v37  ;;  %v189_v47 = vmul.f32 %v766_v29, %v766_v29 }
  0x97   :  { %181 = vadd.xlane.f32.xlu1 %v755_v24 }
  0x99   :  { %v150_v36 = vpop.f32.mrf.mxu3  ;;  %v140_v40 = vpop.f32.mrf.mxu2 }
  0x9a   :  { %v783_v38 = vadd.f32 %v728_v9, %v150_v36  ;;  %v788_v41 = vadd.f32 %v728_v9, %v140_v40  ;;  %v132_v43 = vpop.f32.mrf.mxu1  ;;  %v122_v45 = vpop.f32.mrf.mxu0 }
  0x9b   :  { %v796_v44 = vadd.f32 %v728_v9, %v132_v43  ;;  %v804_v48 = vadd.f32 %v728_v9, %v122_v45 }
  0x9c   :  { %v197_v42 = vmul.f32 %v788_v41, %v788_v41  ;;  %v201_v56 = vmul.f32 %v783_v38, %v783_v38 }
  0x9d   :  { %165 = vadd.xlane.f32.xlu2 %v763_v28  ;;  %219 = vadd.xlane.f32.xlu0 %v195_v26  ;;  %v194_v46 = vmul.f32 %v796_v44, %v796_v44  ;;  %v190_v55 = vmul.f32 %v804_v48, %v804_v48 }
  0x9f   :  { %159 = vadd.xlane.f32.xlu1 %v766_v29 }
  0xa1   :  { %v142_v49 = vpop.f32.mrf.mxu2  ;;  %v152_v50 = vpop.f32.mrf.mxu3 }
  0xa2   :  { %v808_v51 = vadd.f32 %v728_v9, %v142_v49  ;;  %v811_v52 = vadd.f32 %v728_v9, %v152_v50 }
  0xa4   :  { %v198_v54 = vmul.f32 %v808_v51, %v808_v51  ;;  %v202_v57 = vmul.f32 %v811_v52, %v811_v52 }
  0xa5   :  { %205 = vadd.xlane.f32.xlu2 %v188_v32  ;;  %213 = vadd.xlane.f32.xlu0 %v192_v33 }
  0xa7   :  { %221 = vadd.xlane.f32.xlu1 %v196_v34 }
  0xad   :  { %183 = vadd.xlane.f32.xlu2 %v783_v38  ;;  %173 = vadd.xlane.f32.xlu0 %v771_v31 }
  0xaf   :  { %215 = vadd.xlane.f32.xlu1 %v193_v39 }
  0xb5   :  { %223 = vadd.xlane.f32.xlu2 %v197_v42  ;;  %167 = vadd.xlane.f32.xlu0 %v780_v37 }
  0xb7   :  { %175 = vadd.xlane.f32.xlu1 %v788_v41 }
  0xbd   :  { %217 = vadd.xlane.f32.xlu2 %v194_v46  ;;  %207 = vadd.xlane.f32.xlu0 %v189_v47 }
  0xbf   :  { %161 = vadd.xlane.f32.xlu1 %v804_v48 }
  0xc5   :  { %177 = vadd.xlane.f32.xlu2 %v808_v51  ;;  %185 = vadd.xlane.f32.xlu0 %v811_v52 }
  0xc7   :  { %169 = vadd.xlane.f32.xlu1 %v796_v44 }
  0xcd   :  { %229 = vadd.xlane.f32.xlu2 %v200_v53  ;;  %225 = vadd.xlane.f32.xlu0 %v198_v54 }
  0xcf   :  { %209 = vadd.xlane.f32.xlu1 %v190_v55 }
  0xd5   :  { %231 = vadd.xlane.f32.xlu0 %v201_v56  ;;  %v847_v56 = vld [vmem:[%s1083_s2 + $0x1] ss:$0 sm:$0xff] }
  0xd7   :  { %233 = vadd.xlane.f32.xlu1 %v202_v57 }
  0xf8   :  { %v164_v58 = vpop.xlane.xlu2 %163  ;;  %v156_v59 = vpop.xlane.xlu0 %155 }
  0xf9   :  { %v235_v60 = vmul.f32 0.125, %v156_v59  ;;  %v826_v0 = vmul.f32 0.125, %v164_v58 }
  0xfa   :  { %v204_v61 = vpop.xlane.xlu1 %203 }
  0xfb   :  { %v267_v62 = vmul.f32 %v235_v60, %v235_v60  ;;  %v251_v63 = vmul.f32 0.125, %v204_v61  ;;  %v271_v2 = vmul.f32 %v826_v0, %v826_v0  ;;  %v315_v57 = vsub.f32 %v731_v12, %v235_v60 }
  0xfd   :  { %v283_v1 = vsub.f32 %v251_v63, %v267_v62 }
  0xff   :  { %v299_v3 = vmax.f32 %v283_v1, 0.0  ;;  %v855_v1 = vld [vmem:[%s1083_s2 + $0x2] ss:$0 sm:$0xff] }
 0x100   :  { %v212_v4 = vpop.xlane.xlu2 %211  ;;  %v180_v5 = vpop.xlane.xlu0 %179 }
 0x101   :  { %v255_v6 = vmul.f32 0.125, %v212_v4  ;;  %v830_v7 = vmul.f32 0.125, %v180_v5  ;;  %v331_v8 = vadd.f32 1e-05, %v299_v3  ;;  %v319_v5 = vsub.f32 %v734_v13, %v826_v0 }
 0x102   :  { %v228_v9 = vpop.xlane.xlu1 %227 }
 0x103   :  { %v287_v10 = vsub.f32 %v255_v6, %v271_v2  ;;  %v279_v11 = vmul.f32 %v830_v7, %v830_v7  ;;  %v263_v14 = vmul.f32 0.125, %v228_v9  ;;  %638 = vrsqrt.f32 %v331_v8 }
 0x104   :  { %vm353_vm2 = vweird.f32 %v331_v8 }
 0x105   :  { %v303_v15 = vmax.f32 %v287_v10, 0.0  ;;  %v295_v16 = vsub.f32 %v263_v14, %v279_v11 }
 0x107   :  { %v335_v18 = vadd.f32 1e-05, %v303_v15  ;;  %v311_v19 = vmax.f32 %v295_v16, 0.0 }
 0x108   :  { %v172_v20 = vpop.xlane.xlu2 %171  ;;  %v158_v22 = vpop.xlane.xlu0 %157 }
 0x109   :  { %640 = vrsqrt.f32 %v335_v18  ;;  %v343_v25 = vadd.f32 1e-05, %v311_v19  ;;  %v639_v26 = vpop.eup %638  ;;  %v836_v33 = vmul.f32 0.125, %v172_v20  ;;  %v842_v54 = vmul.f32 0.125, %v158_v22 }
 0x10a   :  { %v834_v27 = vpop.xlane.xlu1 %181  ;;  %v348_v30 = vmul.f32 %v639_v26, %v331_v8  ;;  %vm354_vm1 = vweird.f32 %v639_v26  ;;  %vm393_vm5 = vweird.f32 %v335_v18  ;;  %v327_v22 = vsub.f32 %v743_v17, %v830_v7 }
 0x10b   :  { %642 = vrsqrt.f32 %v343_v25  ;;  %v275_v36 = vmul.f32 %v836_v33, %v836_v33  ;;  %vm355_vm3 = vmor %vm353_vm2, %vm354_vm1  ;;  %v268_v12 = vmul.f32 %v842_v54, %v842_v54  ;;  %vm473_vm8 = vweird.f32 %v343_v25 }
 0x10c   :  { %v349_v32 = vmul.f32 %v639_v26, %v348_v30 }
 0x10e   :  { %v350_v35 = vmul.f32 0.5, %v349_v32 }
 0x10f   :  { %v641_v34 = vpop.eup %640 }
 0x110   :  { %v388_v39 = vmul.f32 %v641_v34, %v335_v18  ;;  %v166_v40 = vpop.xlane.xlu2 %165  ;;  %v220_v42 = vpop.xlane.xlu0 %219  ;;  %v351_v45 = vsub.f32 1.5, %v350_v35  ;;  %vm394_vm4 = vweird.f32 %v641_v34 }
 0x111   :  { %v643_v43 = vpop.eup %642  ;;  %v259_v46 = vmul.f32 0.125, %v220_v42  ;;  %v850_v62 = vmul.f32 0.125, %v166_v40  ;;  %vm395_vm7 = vmor %vm393_vm5, %vm394_vm4 }
 0x112   :  { %v389_v47 = vmul.f32 %v641_v34, %v388_v39  ;;  %v468_v49 = vmul.f32 %v643_v43, %v343_v25  ;;  %v840_v50 = vpop.xlane.xlu1 %159  ;;  %v352_v53 = vmul.f32 %v639_v26, %v351_v45  ;;  %vm474_vm6 = vweird.f32 %v643_v43 }
 0x113   :  { %v291_v55 = vsub.f32 %v259_v46, %v275_v36  ;;  %v272_v14 = vmul.f32 %v850_v62, %v850_v62  ;;  %vm475_vm9 = vmor %vm473_vm8, %vm474_vm6 }
 0x114   :  { %v390_v58 = vmul.f32 0.5, %v389_v47  ;;  %v469_v59 = vmul.f32 %v643_v43, %v468_v49  ;;  %v356_v61 = vsel %vm355_vm3, %v639_v26, %v352_v53 }
 0x115   :  { %v307_v63 = vmax.f32 %v291_v55, 0.0  ;;  %v507_v2 = vmul.f32 %v356_v61, %v315_v57 }
 0x116   :  { %v391_v3 = vsub.f32 1.5, %v390_v58  ;;  %v470_v4 = vmul.f32 0.5, %v469_v59 }
 0x117   :  { %v339_v60 = vadd.f32 1e-05, %v307_v63  ;;  %v525_v6 = vmul.f32 %v847_v56, %v507_v2 }
 0x118   :  { %v392_v8 = vmul.f32 %v641_v34, %v391_v3  ;;  %v471_v9 = vsub.f32 1.5, %v470_v4  ;;  %v206_v10 = vpop.xlane.xlu2 %205  ;;  %v214_v11 = vpop.xlane.xlu0 %213 }
 0x119   :  { %644 = vrsqrt.f32 %v339_v60  ;;  %v252_v15 = vmul.f32 0.125, %v206_v10  ;;  %v256_v16 = vmul.f32 0.125, %v214_v11  ;;  %v543_v13 = vadd.f32 %v855_v1, %v525_v6 }
 0x11a   :  { %v396_v0 = vsel %vm395_vm7, %v641_v34, %v392_v8  ;;  %v472_v18 = vmul.f32 %v643_v43, %v471_v9  ;;  %v222_v19 = vpop.xlane.xlu1 %221  ;;  %vm433_vm11 = vweird.f32 %v339_v60  ;;  %v323_v9 = vsub.f32 %v749_v21, %v836_v33 }
 0x11b   :  { %v511_v20 = vmul.f32 %v396_v0, %v319_v5  ;;  %v284_v26 = vsub.f32 %v252_v15, %v268_v12  ;;  %v288_v30 = vsub.f32 %v256_v16, %v272_v14  ;;  %559 = vst [vmem:[%s1084_s3] sm:$0xff] %v543_v13  ;;  %v260_v58 = vmul.f32 0.125, %v222_v19 }
 0x11c   :  { %v476_v32 = vsel %vm475_vm9, %v643_v43, %v472_v18 }
 0x11d   :  { %v529_v35 = vmul.f32 %v847_v56, %v511_v20  ;;  %v519_v36 = vmul.f32 %v476_v32, %v327_v22  ;;  %v300_v34 = vmax.f32 %v284_v26, 0.0  ;;  %v304_v39 = vmax.f32 %v288_v30, 0.0 }
 0x11e   :  { %v904_v32 = vmul.f32 0.125, %v840_v50 }
 0x11f   :  { %v645_v25 = vpop.eup %644  ;;  %v547_v40 = vadd.f32 %v855_v1, %v529_v35  ;;  %v537_v42 = vmul.f32 %v847_v56, %v519_v36  ;;  %v332_v17 = vadd.f32 1e-05, %v300_v34  ;;  %v874_v7 = vadd.f32 1e-05, %v304_v39 }
 0x120   :  { %v428_v45 = vmul.f32 %v645_v25, %v339_v60  ;;  %v876_v46 = vpop.xlane.xlu2 %183  ;;  %v174_v47 = vpop.xlane.xlu0 %173  ;;  %vm434_vm10 = vweird.f32 %v645_v25 }
 0x121   :  { %563 = vst [vmem:[%s1084_s3 + $0x20] sm:$0xff] %v547_v40  ;;  %v555_v43 = vadd.f32 %v855_v1, %v537_v42  ;;  %646 = vrsqrt.f32 %v332_v17  ;;  %v883_v53 = vmul.f32 0.125, %v174_v47  ;;  %vm435_vm12 = vmor %vm433_vm11, %vm434_vm10  ;;  %v316_v40 = vsub.f32 %v752_v23, %v842_v54 }
 0x122   :  { %v429_v49 = vmul.f32 %v645_v25, %v428_v45  ;;  %648 = vrsqrt.f32 %v874_v7  ;;  %v216_v55 = vpop.xlane.xlu1 %215  ;;  %vm363_vm15 = vweird.f32 %v332_v17  ;;  %vm403_vm1 = vweird.f32 %v874_v7 }
 0x123   :  { %571 = vst [vmem:[%s1084_s3 + $0x60] sm:$0xff] %v555_v43  ;;  %v276_v59 = vmul.f32 %v883_v53, %v883_v53  ;;  %v257_v60 = vmul.f32 0.125, %v216_v55  ;;  %v320_v23 = vsub.f32 %v763_v28, %v850_v62 }
 0x124   :  { %v430_v57 = vmul.f32 0.5, %v429_v49 }
 0x125   :  { %v292_v63 = vsub.f32 %v260_v58, %v276_v59  ;;  %v269_v59 = vmul.f32 %v904_v32, %v904_v32 }
 0x126   :  { %v431_v61 = vsub.f32 1.5, %v430_v57 }
 0x127   :  { %v647_v2 = vpop.eup %646  ;;  %v308_v12 = vmax.f32 %v292_v63, 0.0 }
 0x128   :  { %v649_v3 = vpop.eup %648  ;;  %v432_v4 = vmul.f32 %v645_v25, %v431_v61  ;;  %v358_v5 = vmul.f32 %v647_v2, %v332_v17  ;;  %v224_v6 = vpop.xlane.xlu2 %223  ;;  %vm364_vm13 = vweird.f32 %v647_v2 }
 0x129   :  { %v168_v8 = vpop.xlane.xlu0 %167  ;;  %v398_v10 = vmul.f32 %v649_v3, %v874_v7  ;;  %v895_v16 = vadd.f32 1e-05, %v308_v12  ;;  %v261_v21 = vmul.f32 0.125, %v224_v6  ;;  %vm404_vm14 = vweird.f32 %v649_v3  ;;  %vm365_vm0 = vmor %vm363_vm15, %vm364_vm13 }
 0x12a   :  { %v893_v11 = vmul.f32 0.125, %v168_v8  ;;  %v436_v14 = vsel %vm435_vm12, %v645_v25, %v432_v4  ;;  %v359_v15 = vmul.f32 %v647_v2, %v358_v5  ;;  %v176_v13 = vpop.xlane.xlu1 %175  ;;  %vm405_vm2 = vmor %vm403_vm1, %vm404_vm14 }
 0x12b   :  { %v515_v0 = vmul.f32 %v436_v14, %v323_v9  ;;  %v399_v18 = vmul.f32 %v649_v3, %v398_v10  ;;  %650 = vrsqrt.f32 %v895_v16  ;;  %v900_v33 = vmul.f32 0.125, %v176_v13 }
 0x12c   :  { %v273_v19 = vmul.f32 %v893_v11, %v893_v11  ;;  %v360_v20 = vmul.f32 0.5, %v359_v15  ;;  %vm443_vm4 = vweird.f32 %v895_v16 }
 0x12d   :  { %v533_v22 = vmul.f32 %v847_v56, %v515_v0  ;;  %v400_v26 = vmul.f32 0.5, %v399_v18  ;;  %v277_v36 = vmul.f32 %v900_v33, %v900_v33 }
 0x12e   :  { %v289_v30 = vsub.f32 %v257_v60, %v273_v19  ;;  %v361_v35 = vsub.f32 1.5, %v360_v20 }
 0x12f   :  { %v551_v34 = vadd.f32 %v855_v1, %v533_v22  ;;  %v401_v39 = vsub.f32 1.5, %v400_v26  ;;  %v293_v45 = vsub.f32 %v261_v21, %v277_v36  ;;  %v324_v26 = vsub.f32 %v771_v31, %v883_v53 }
 0x130   :  { %v305_v25 = vmax.f32 %v289_v30, 0.0  ;;  %v362_v42 = vmul.f32 %v647_v2, %v361_v35  ;;  %v218_v47 = vpop.xlane.xlu2 %217  ;;  %v321_v30 = vsub.f32 %v780_v37, %v893_v11 }
 0x131   :  { %v208_v43 = vpop.xlane.xlu0 %207  ;;  %567 = vst [vmem:[%s1084_s3 + $0x40] sm:$0xff] %v551_v34  ;;  %v402_v50 = vmul.f32 %v649_v3, %v401_v39  ;;  %v651_v57 = vpop.eup %650  ;;  %v309_v17 = vmax.f32 %v293_v45, 0.0  ;;  %v325_v34 = vsub.f32 %v788_v41, %v900_v33 }
 0x132   :  { %v915_v49 = vadd.f32 1e-05, %v305_v25  ;;  %v253_v55 = vmul.f32 0.125, %v208_v43  ;;  %v366_v54 = vsel %vm365_vm0, %v647_v2, %v362_v42  ;;  %v162_v58 = vpop.xlane.xlu1 %161  ;;  %v438_v4 = vmul.f32 %v651_v57, %v895_v16 }
 0x133   :  { %v508_v61 = vmul.f32 %v366_v54, %v316_v40  ;;  %v406_v63 = vsel %vm405_vm2, %v649_v3, %v402_v50  ;;  %v924_v5 = vadd.f32 1e-05, %v309_v17  ;;  %v931_v3 = vmul.f32 0.125, %v834_v27 }
 0x134   :  { %v512_v7 = vmul.f32 %v406_v63, %v320_v23  ;;  %652 = vrsqrt.f32 %v915_v49  ;;  %v439_v28 = vmul.f32 %v651_v57, %v438_v4  ;;  %v285_v62 = vsub.f32 %v253_v55, %v269_v59 }
 0x135   :  { %v526_v12 = vmul.f32 %v847_v56, %v508_v61  ;;  %654 = vrsqrt.f32 %v924_v5  ;;  %vm444_vm3 = vweird.f32 %v651_v57  ;;  %v945_v20 = vmul.f32 0.125, %v162_v58 }
 0x136   :  { %v530_v2 = vmul.f32 %v847_v56, %v512_v7  ;;  %v440_v8 = vmul.f32 0.5, %v439_v28  ;;  %v301_v9 = vmax.f32 %v285_v62, 0.0  ;;  %v280_v22 = vmul.f32 %v931_v3, %v931_v3  ;;  %vm445_vm5 = vmor %vm443_vm4, %vm444_vm3 }
 0x137   :  { %v544_v6 = vadd.f32 %v855_v1, %v526_v12  ;;  %vm413_vm6 = vweird.f32 %v915_v49  ;;  %v258_v40 = vmul.f32 0.125, %v218_v47  ;;  %vm453_vm7 = vweird.f32 %v924_v5 }
 0x138   :  { %v548_v10 = vadd.f32 %v855_v1, %v530_v2  ;;  %v178_v14 = vpop.xlane.xlu2 %177  ;;  %v441_v13 = vsub.f32 1.5, %v440_v8  ;;  %v937_v0 = vadd.f32 1e-05, %v301_v9  ;;  %v270_v37 = vmul.f32 %v945_v20, %v945_v20 }
 0x139   :  { %v186_v15 = vpop.xlane.xlu0 %185  ;;  %560 = vst [vmem:[%s1084_s3 + $0x8] sm:$0xff] %v544_v6  ;;  %v953_v16 = vmul.f32 0.125, %v178_v14 }
 0x13a   :  { %v653_v18 = vpop.eup %652  ;;  %564 = vst [vmem:[%s1084_s3 + $0x28] sm:$0xff] %v548_v10  ;;  %v170_v27 = vpop.xlane.xlu1 %169  ;;  %v442_v60 = vmul.f32 %v651_v57, %v441_v13  ;;  %656 = vrsqrt.f32 %v937_v0  ;;  %v977_v28 = vmul.f32 0.125, %v186_v15  ;;  %vm373_vm13 = vweird.f32 %v937_v0 }
 0x13b   :  { %v408_v19 = vmul.f32 %v653_v18, %v915_v49  ;;  %v655_v21 = vpop.eup %654  ;;  %v959_v42 = vmul.f32 0.125, %v170_v27  ;;  %vm414_vm8 = vweird.f32 %v653_v18  ;;  %v278_v41 = vmul.f32 %v953_v16, %v953_v16 }
 0x13c   :  { %v446_v35 = vsel %vm445_vm5, %v651_v57, %v442_v60  ;;  %v448_v39 = vmul.f32 %v655_v21, %v924_v5  ;;  %vm454_vm9 = vweird.f32 %v655_v21  ;;  %vm415_vm10 = vmor %vm413_vm6, %vm414_vm8  ;;  %v317_v5 = vsub.f32 %v766_v29, %v904_v32 }
 0x13d   :  { %v409_v36 = vmul.f32 %v653_v18, %v408_v19  ;;  %v516_v25 = vmul.f32 %v446_v35, %v324_v26  ;;  %v274_v33 = vmul.f32 %v959_v42, %v959_v42  ;;  %vm455_vm11 = vmor %vm453_vm7, %vm454_vm9  ;;  %v993_v35 = vmul.f32 0.125, %v876_v46 }
 0x13e   :  { %v449_v53 = vmul.f32 %v655_v21, %v448_v39 }
 0x13f   :  { %v410_v31 = vmul.f32 0.5, %v409_v36  ;;  %v534_v11 = vmul.f32 %v847_v56, %v516_v25  ;;  %v290_v58 = vsub.f32 %v258_v40, %v274_v33  ;;  %v281_v25 = vmul.f32 %v993_v35, %v993_v35 }
 0x140   :  { %v230_v45 = vpop.xlane.xlu2 %229  ;;  %v657_v43 = vpop.eup %656  ;;  %v450_v55 = vmul.f32 0.5, %v449_v53 }
 0x141   :  { %v226_v47 = vpop.xlane.xlu0 %225  ;;  %v411_v50 = vsub.f32 1.5, %v410_v31  ;;  %v264_v57 = vmul.f32 0.125, %v230_v45  ;;  %v552_v54 = vadd.f32 %v855_v1, %v534_v11  ;;  %v368_v17 = vmul.f32 %v657_v43, %v937_v0 }
 0x142   :  { %v262_v23 = vmul.f32 0.125, %v226_v47  ;;  %v210_v59 = vpop.xlane.xlu1 %209  ;;  %v451_v63 = vsub.f32 1.5, %v450_v55  ;;  %v306_v62 = vmax.f32 %v290_v58, 0.0  ;;  %vm374_vm12 = vweird.f32 %v657_v43 }
 0x143   :  { %v412_v61 = vmul.f32 %v653_v18, %v411_v50  ;;  %v296_v4 = vsub.f32 %v264_v57, %v280_v22  ;;  %568 = vst [vmem:[%s1084_s3 + $0x48] sm:$0xff] %v552_v54  ;;  %v369_v12 = vmul.f32 %v657_v43, %v368_v17  ;;  %v254_v2 = vmul.f32 0.125, %v210_v59  ;;  %vm375_vm14 = vmor %vm373_vm13, %vm374_vm12 }
 0x144   :  { %v294_v7 = vsub.f32 %v262_v23, %v278_v41  ;;  %v452_v8 = vmul.f32 %v655_v21, %v451_v63  ;;  %v982_v27 = vadd.f32 1e-05, %v306_v62  ;;  %v282_v31 = vmul.f32 %v977_v28, %v977_v28 }
 0x145   :  { %v416_v6 = vsel %vm415_vm10, %v653_v18, %v412_v61  ;;  %v312_v9 = vmax.f32 %v296_v4, 0.0  ;;  %v370_v13 = vmul.f32 0.5, %v369_v12  ;;  %v286_v19 = vsub.f32 %v254_v2, %v270_v37 }
 0x146   :  { %v310_v10 = vmax.f32 %v294_v7, 0.0  ;;  %v513_v14 = vmul.f32 %v416_v6, %v321_v30  ;;  %v456_v49 = vsel %vm455_vm11, %v655_v21, %v452_v8  ;;  %658 = vrsqrt.f32 %v982_v27 }
 0x147   :  { %v984_v60 = vadd.f32 1e-05, %v312_v9  ;;  %v517_v22 = vmul.f32 %v456_v49, %v325_v34  ;;  %v371_v26 = vsub.f32 1.5, %v370_v13  ;;  %v302_v29 = vmax.f32 %v286_v19, 0.0 }
 0x148   :  { %v986_v15 = vadd.f32 1e-05, %v310_v10  ;;  %v531_v18 = vmul.f32 %v847_v56, %v513_v14  ;;  %vm423_vm1 = vweird.f32 %v982_v27  ;;  %v322_v13 = vsub.f32 %v796_v44, %v959_v42 }
 0x149   :  { %v232_v30 = vpop.xlane.xlu0 %231  ;;  %660 = vrsqrt.f32 %v984_v60  ;;  %v535_v36 = vmul.f32 %v847_v56, %v517_v22  ;;  %v372_v39 = vmul.f32 %v657_v43, %v371_v26  ;;  %v1009_v37 = vadd.f32 1e-05, %v302_v29 }
 0x14a   :  { %v549_v21 = vadd.f32 %v855_v1, %v531_v18  ;;  %662 = vrsqrt.f32 %v986_v15  ;;  %v234_v34 = vpop.xlane.xlu1 %233  ;;  %v265_v46 = vmul.f32 0.125, %v232_v30  ;;  %vm483_vm4 = vweird.f32 %v984_v60 }
 0x14b   :  { %v266_v32 = vmul.f32 0.125, %v234_v34  ;;  %v553_v0 = vadd.f32 %v855_v1, %v535_v36  ;;  %v376_v40 = vsel %vm375_vm14, %v657_v43, %v372_v39  ;;  %664 = vrsqrt.f32 %v1009_v37 }
 0x14c   :  { %565 = vst [vmem:[%s1084_s3 + $0x30] sm:$0xff] %v549_v21  ;;  %v509_v53 = vmul.f32 %v376_v40, %v317_v5  ;;  %v297_v11 = vsub.f32 %v265_v46, %v281_v25  ;;  %v659_v41 = vpop.eup %658  ;;  %v328_v18 = vsub.f32 %v755_v24, %v931_v3  ;;  %vm463_vm6 = vweird.f32 %v986_v15 }
 0x14d   :  { %569 = vst [vmem:[%s1084_s3 + $0x50] sm:$0xff] %v553_v0  ;;  %v298_v33 = vsub.f32 %v266_v32, %v282_v31  ;;  %v418_v50 = vmul.f32 %v659_v41, %v982_v27  ;;  %vm424_vm15 = vweird.f32 %v659_v41  ;;  %v326_v27 = vsub.f32 %v808_v51, %v953_v16 }
 0x14e   :  { %v527_v47 = vmul.f32 %v847_v56, %v509_v53  ;;  %v313_v57 = vmax.f32 %v297_v11, 0.0  ;;  %vm425_vm3 = vmor %vm423_vm1, %vm424_vm15  ;;  %vm383_vm9 = vweird.f32 %v1009_v37  ;;  %v318_v32 = vsub.f32 %v804_v48, %v945_v20 }
 0x14f   :  { %v661_v45 = vpop.eup %660  ;;  %v419_v54 = vmul.f32 %v659_v41, %v418_v50  ;;  %v314_v61 = vmax.f32 %v298_v33, 0.0 }
 0x150   :  { %v663_v43 = vpop.eup %662  ;;  %v478_v55 = vmul.f32 %v661_v45, %v984_v60  ;;  %v545_v23 = vadd.f32 %v855_v1, %v527_v47  ;;  %v1020_v59 = vadd.f32 1e-05, %v313_v57  ;;  %vm484_vm0 = vweird.f32 %v661_v45 }
 0x151   :  { %v458_v17 = vmul.f32 %v663_v43, %v986_v15  ;;  %v420_v63 = vmul.f32 0.5, %v419_v54  ;;  %v1026_v12 = vadd.f32 1e-05, %v314_v61  ;;  %v665_v62 = vpop.eup %664  ;;  %vm464_vm2 = vweird.f32 %v663_v43  ;;  %vm485_vm5 = vmor %vm483_vm4, %vm484_vm0 }
 0x152   :  { %v479_v58 = vmul.f32 %v661_v45, %v478_v55  ;;  %561 = vst [vmem:[%s1084_s3 + $0x10] sm:$0xff] %v545_v23  ;;  %666 = vrsqrt.f32 %v1020_v59  ;;  %v378_v9 = vmul.f32 %v665_v62, %v1009_v37  ;;  %vm465_vm7 = vmor %vm463_vm6, %vm464_vm2  ;;  %vm384_vm8 = vweird.f32 %v665_v62 }
 0x153   :  { %v459_v4 = vmul.f32 %v663_v43, %v458_v17  ;;  %v421_v2 = vsub.f32 1.5, %v420_v63  ;;  %668 = vrsqrt.f32 %v1026_v12  ;;  %vm385_vm10 = vmor %vm383_vm9, %vm384_vm8  ;;  %vm493_vm12 = vweird.f32 %v1020_v59 }
 0x154   :  { %v480_v7 = vmul.f32 0.5, %v479_v58  ;;  %v379_v19 = vmul.f32 %v665_v62, %v378_v9  ;;  %v329_v47 = vsub.f32 %v783_v38, %v993_v35  ;;  %vm503_vm15 = vweird.f32 %v1026_v12 }
 0x155   :  { %v460_v6 = vmul.f32 0.5, %v459_v4  ;;  %v422_v10 = vmul.f32 %v659_v41, %v421_v2  ;;  %v330_v57 = vsub.f32 %v811_v52, %v977_v28 }
 0x156   :  { %v481_v8 = vsub.f32 1.5, %v480_v7  ;;  %v380_v44 = vmul.f32 0.5, %v379_v19 }
 0x157   :  { %v461_v14 = vsub.f32 1.5, %v460_v6  ;;  %v426_v22 = vsel %vm425_vm3, %v659_v41, %v422_v10 }
 0x158   :  { %v482_v49 = vmul.f32 %v661_v45, %v481_v8  ;;  %v667_v30 = vpop.eup %666  ;;  %v514_v5 = vmul.f32 %v426_v22, %v322_v13  ;;  %v381_v34 = vsub.f32 1.5, %v380_v44 }
 0x159   :  { %v462_v26 = vmul.f32 %v663_v43, %v461_v14  ;;  %v488_v36 = vmul.f32 %v667_v30, %v1020_v59  ;;  %v669_v39 = vpop.eup %668  ;;  %vm494_vm11 = vweird.f32 %v667_v30 }
 0x15a   :  { %v486_v21 = vsel %vm485_vm5, %v661_v45, %v482_v49  ;;  %v532_v24 = vmul.f32 %v847_v56, %v514_v5  ;;  %v498_v51 = vmul.f32 %v669_v39, %v1026_v12  ;;  %v382_v46 = vmul.f32 %v665_v62, %v381_v34  ;;  %vm495_vm14 = vmor %vm493_vm12, %vm494_vm11 }
 0x15b   :  { %v520_v42 = vmul.f32 %v486_v21, %v328_v18  ;;  %v466_v60 = vsel %vm465_vm7, %v663_v43, %v462_v26  ;;  %v489_v25 = vmul.f32 %v667_v30, %v488_v36  ;;  %vm504_vm13 = vweird.f32 %v669_v39 }
 0x15c   :  { %v518_v3 = vmul.f32 %v466_v60, %v326_v27  ;;  %v550_v16 = vadd.f32 %v855_v1, %v532_v24  ;;  %v499_v31 = vmul.f32 %v669_v39, %v498_v51  ;;  %v386_v11 = vsel %vm385_vm10, %v665_v62, %v382_v46  ;;  %vm505_vm0 = vmor %vm503_vm15, %vm504_vm13 }
 0x15d   :  { %v538_v15 = vmul.f32 %v847_v56, %v520_v42  ;;  %v490_v40 = vmul.f32 0.5, %v489_v25  ;;  %v510_v37 = vmul.f32 %v386_v11, %v318_v32 }
 0x15e   :  { %v536_v29 = vmul.f32 %v847_v56, %v518_v3  ;;  %566 = vst [vmem:[%s1084_s3 + $0x38] sm:$0xff] %v550_v16  ;;  %v500_v48 = vmul.f32 0.5, %v499_v31 }
 0x15f   :  { %v556_v0 = vadd.f32 %v855_v1, %v538_v15  ;;  %v491_v41 = vsub.f32 1.5, %v490_v40  ;;  %v528_v20 = vmul.f32 %v847_v56, %v510_v37 }
 0x160   :  { %v554_v53 = vadd.f32 %v855_v1, %v536_v29  ;;  %v501_v45 = vsub.f32 1.5, %v500_v48 }
 0x161   :  { %572 = vst [vmem:[%s1084_s3 + $0x68] sm:$0xff] %v556_v0  ;;  %v492_v33 = vmul.f32 %v667_v30, %v491_v41  ;;  %v546_v50 = vadd.f32 %v855_v1, %v528_v20 }
 0x162   :  { %570 = vst [vmem:[%s1084_s3 + $0x58] sm:$0xff] %v554_v53  ;;  %v502_v55 = vmul.f32 %v669_v39, %v501_v45 }
 0x163   :  { %v496_v43 = vsel %vm495_vm14, %v667_v30, %v492_v33  ;;  %562 = vst [vmem:[%s1084_s3 + $0x18] sm:$0xff] %v546_v50 }
 0x164   :  { %v521_v23 = vmul.f32 %v496_v43, %v329_v47  ;;  %v506_v54 = vsel %vm505_vm0, %v669_v39, %v502_v55 }
 0x165   :  { %v522_v38 = vmul.f32 %v506_v54, %v330_v57 }
 0x166   :  { %v539_v17 = vmul.f32 %v847_v56, %v521_v23 }
 0x167   :  { %v540_v58 = vmul.f32 %v847_v56, %v522_v38 }
 0x168   :  { %v557_v35 = vadd.f32 %v855_v1, %v539_v17 }
 0x169   :  { %v558_v52 = vadd.f32 %v855_v1, %v540_v58 }
 0x16a   :  { %573 = vst [vmem:[%s1084_s3 + $0x70] sm:$0xff] %v557_v35 }
 0x16b   :  { %574 = vst [vmem:[%s1084_s3 + $0x78] sm:$0xff] %v558_v52 }

</bundles_post_ra>
